<compile_context>
chip_gen: v6e
topology: v6e:2x2x1
jax: 0.10.0
libtpu: 0.0.40
codegen_flags: <defaults>
</compile_context>

<pallas_src>
import jax
import jax.numpy as jnp
from jax.experimental import pallas as pl
from jax.experimental.pallas import tpu as pltpu

# Original layer sizes (define_parameters(): 200/60/30, 6 actions).
IN_DIM = 36
L1, L2, L3, OUT_DIM = 200, 60, 30, 6

# Lane/sublane padded sizes used inside the kernel.
L1P, L2P, L3P = 256, 128, 128     # hidden widths padded to multiples of 128
OUTP = 8                          # output HBM width (>= 6, one lane group)
NEG_INF = -1e30                   # bias for padded action lanes -> exp() == 0

# Packed-weight layout (bf16, 256 columns wide, row offsets 16-aligned):
#   rows [  0,  48) cols [  0,256): W1 (36 x 200 real)
#   rows [ 48, 304) cols [  0,128): W2 (200 x 60 real)
#   rows [ 48, 176) cols [128,256): W3 (60 x 30 real)
#   rows [176, 304) cols [128,256): W4 (30 x 6 real)
W1_R0 = 0
W2_R0 = 48
W3_R0 = 48
W4_R0 = W3_R0 + L2P               # 176
WPACK_ROWS = W2_R0 + L1P          # 304
WPACK_COLS = 256


def _round_up(n, m):
    return ((n + m - 1) // m) * m


def _cdiv(a, b):
    return (a + b - 1) // b


def _mlp_softmax_kernel(x_ref, w_ref, b_ref, o_ref):
    # x tile (TB, 36) f32 -> bf16 operands for the MXU, f32 accumulation.
    x = x_ref[...].astype(jnp.bfloat16)

    # Layer 1: (TB,36) @ (36,256)
    w1 = w_ref[0:IN_DIM, :]
    b1 = b_ref[0:1, 0:L1P]
    h1 = jnp.dot(x, w1, preferred_element_type=jnp.float32) + b1
    h1 = jnp.maximum(h1, 0.0).astype(jnp.bfloat16)

    # Layer 2: (TB,256) @ (256,128)
    w2 = w_ref[W2_R0:W2_R0 + L1P, 0:L2P]
    b2 = b_ref[1:2, 0:L2P]
    h2 = jnp.dot(h1, w2, preferred_element_type=jnp.float32) + b2
    h2 = jnp.maximum(h2, 0.0).astype(jnp.bfloat16)

    # Layer 3: (TB,128) @ (128,128)
    w3 = w_ref[W3_R0:W3_R0 + L2P, L2P:L2P + L3P]
    b3 = b_ref[2:3, 0:L3P]
    h3 = jnp.dot(h2, w3, preferred_element_type=jnp.float32) + b3
    h3 = jnp.maximum(h3, 0.0).astype(jnp.bfloat16)

    # Layer 4: (TB,128) @ (128,128); real logits in lanes 0..5, padded lanes
    # carry a -1e30 bias so max-stabilized exp() is exactly 0 there.
    w4 = w_ref[W4_R0:W4_R0 + L3P, L2P:L2P + L3P]
    b4 = b_ref[3:4, 0:L3P]
    logits = jnp.dot(h3, w4, preferred_element_type=jnp.float32) + b4

    m = jnp.max(logits, axis=-1, keepdims=True)
    e = jnp.exp(logits - m)
    denom = jnp.sum(e, axis=-1, keepdims=True)
    probs = e * pl.reciprocal(denom, approx=False)   # exact: rows sum to 1

    # Only the first lane group (8 lanes) is written back to HBM.
    o_ref[...] = probs[:, 0:OUTP]


def dqn_supa_soldier_forward(x, packed_params, *, tb=256):
    """x: (B, 36) float32 -> (B, 6) float32 softmax probabilities."""
    B = x.shape[0]
    # >= 2 grid steps whenever possible (v7x megacore), padding waste bounded
    # by one small tile, tile rows a multiple of 8.
    n_tiles = max(2, _cdiv(B, tb))
    TB = _round_up(_cdiv(B, n_tiles), 8)
    Bp = _round_up(B, TB)
    if Bp != B:
        x = jnp.pad(x, ((0, Bp - B), (0, 0)))   # padded rows sliced off below

    w_pack, b_pack = packed_params
    const = lambda i: (0, 0)                    # weights/biases resident across the grid

    out = pl.pallas_call(
        _mlp_softmax_kernel,
        out_shape=jax.ShapeDtypeStruct((Bp, OUTP), jnp.float32),
        grid=(Bp // TB,),
        in_specs=[
            pl.BlockSpec((TB, IN_DIM), lambda i: (i, 0)),
            pl.BlockSpec((WPACK_ROWS, WPACK_COLS), const),
            pl.BlockSpec((4, WPACK_COLS), const),
        ],
        out_specs=pl.BlockSpec((TB, OUTP), lambda i: (i, 0)),
        compiler_params=pltpu.CompilerParams(
            dimension_semantics=("parallel",)),
    )(x, w_pack, b_pack)

    return out[:B, :OUT_DIM]


def init_params(key):
    """torch.nn.Linear-style init (uniform +/- 1/sqrt(fan_in)), f32, original sizes.

    Weights stored (in_features, out_features); biases (1, out_features).
    """
    dims = [(IN_DIM, L1), (L1, L2), (L2, L3), (L3, OUT_DIM)]
    params = []
    for (fan_in, fan_out) in dims:
        key, kw, kb = jax.random.split(key, 3)
        bound = 1.0 / jnp.sqrt(jnp.float32(fan_in))
        w = jax.random.uniform(kw, (fan_in, fan_out), jnp.float32, -bound, bound)
        b = jax.random.uniform(kb, (1, fan_out), jnp.float32, -bound, bound)
        params.extend([w, b])
    return tuple(params)


def prepare_params(params_f32):
    """Pack the 8 arrays into one bf16 weight buffer + one f32 bias buffer.

    Padding is exact: padded hidden units get weight 0 / bias 0 (ReLU -> 0 and
    the next layer's rows for them are 0); padded action lanes get bias -1e30
    so the in-kernel softmax ignores them exactly.
    """
    (w1, b1, w2, b2, w3, b3, w4, b4) = params_f32

    wpack = jnp.zeros((WPACK_ROWS, WPACK_COLS), jnp.float32)
    wpack = wpack.at[W1_R0:W1_R0 + w1.shape[0], 0:w1.shape[1]].set(w1)
    wpack = wpack.at[W2_R0:W2_R0 + w2.shape[0], 0:w2.shape[1]].set(w2)
    wpack = wpack.at[W3_R0:W3_R0 + w3.shape[0], L2P:L2P + w3.shape[1]].set(w3)
    wpack = wpack.at[W4_R0:W4_R0 + w4.shape[0], L2P:L2P + w4.shape[1]].set(w4)
    wpack = wpack.astype(jnp.bfloat16)

    bpack = jnp.zeros((4, WPACK_COLS), jnp.float32)
    bpack = bpack.at[3, :].set(NEG_INF)              # padded action lanes
    bpack = bpack.at[0, 0:b1.shape[1]].set(b1[0])
    bpack = bpack.at[1, 0:b2.shape[1]].set(b2[0])
    bpack = bpack.at[2, 0:b3.shape[1]].set(b3[0])
    bpack = bpack.at[3, 0:b4.shape[1]].set(b4[0])
    return wpack, bpack


def _reference_forward(x, params_f32):
    (w1, b1, w2, b2, w3, b3, w4, b4) = params_f32
    h = jnp.maximum(x @ w1 + b1, 0.0)
    h = jnp.maximum(h @ w2 + b2, 0.0)
    h = jnp.maximum(h @ w3 + b3, 0.0)
    return jax.nn.softmax(h @ w4 + b4, axis=-1)


if __name__ == "__main__":
    key = jax.random.PRNGKey(0)
    kx, kx2, kp = jax.random.split(key, 3)

    params = init_params(kp)
    packed_params = prepare_params(params)

    # Deployment-style batch: 2 flattened game states (state_old.reshape((1,36))
    # semantics, batched to 2); feature values in a plausible 0..8 range.
    x = jax.random.uniform(kx, (2, IN_DIM), jnp.float32, 0.0, 8.0)
    out = jax.block_until_ready(dqn_supa_soldier_forward(x, packed_params))
    ref = _reference_forward(x, params)
    assert out.shape == (2, OUT_DIM)
    # bf16 MXU operands vs f32 reference: loosened elementwise tolerance.
    assert jnp.allclose(out, ref, atol=2e-2, rtol=2e-2), float(jnp.max(jnp.abs(out - ref)))
    assert jnp.allclose(jnp.sum(out, axis=-1), 1.0, atol=1e-4)

    # Second small batch exercising a multi-step grid + batch padding path.
    x2 = jax.random.uniform(kx2, (20, IN_DIM), jnp.float32, 0.0, 8.0)
    out2 = jax.block_until_ready(dqn_supa_soldier_forward(x2, packed_params))
    ref2 = _reference_forward(x2, params)
    assert out2.shape == (20, OUT_DIM)
    assert jnp.allclose(out2, ref2, atol=2e-2, rtol=2e-2), float(jnp.max(jnp.abs(out2 - ref2)))
    assert jnp.allclose(jnp.sum(out2, axis=-1), 1.0, atol=1e-4)

    print("KERNEL_OK")
</pallas_src>

<mosaic_0001>
module attributes {stable_mosaic.version = 11 : i64} {
  func.func @_mlp_softmax_kernel(%arg0: i32, %arg1: memref<8x36xf32, #tpu.memory_space<vmem>>, %arg2: memref<304x256xbf16, #tpu.memory_space<vmem>>, %arg3: memref<4x256xf32, #tpu.memory_space<vmem>>, %arg4: memref<8x8xf32, #tpu.memory_space<vmem>>) attributes {dimension_semantics = [#tpu.dimension_semantics<parallel>], iteration_bounds = array<i64: 1>, scalar_prefetch = 0 : i64, scratch_operands = 0 : i64, tpu.core_type = #tpu.core_type<tc>, window_params = [{transform_indices = @transform_0, window_bounds = array<i64: 8, 36>}, {pipeline_mode = #tpu.pipeline_mode<synchronous>, transform_indices = @transform_1, window_bounds = array<i64: 304, 256>}, {pipeline_mode = #tpu.pipeline_mode<synchronous>, transform_indices = @transform_2, window_bounds = array<i64: 4, 256>}, {transform_indices = @transform_3, window_bounds = array<i64: 8, 8>}]} {
    %c0 = arith.constant 0 : index
    %c0_0 = arith.constant 0 : index
    %0 = vector.load %arg1[%c0, %c0_0] : memref<8x36xf32, #tpu.memory_space<vmem>>, vector<8x36xf32>
    %1 = arith.truncf %0 : vector<8x36xf32> to vector<8x36xbf16>
    %c0_1 = arith.constant 0 : index
    %c0_2 = arith.constant 0 : index
    %2 = vector.load %arg2[%c0_1, %c0_2] : memref<304x256xbf16, #tpu.memory_space<vmem>>, vector<36x256xbf16>
    %c0_3 = arith.constant 0 : index
    %c0_4 = arith.constant 0 : index
    %3 = vector.load %arg3[%c0_3, %c0_4] : memref<4x256xf32, #tpu.memory_space<vmem>>, vector<1x256xf32>
    %cst = arith.constant dense<0.000000e+00> : vector<8x256xf32>
    %4 = tpu.matmul %1, %2, %cst {dimension_numbers = #tpu.dot_dimension_numbers<[1], [0], [0], [1], [0, 0, 1, 1], [], []>} : vector<8x36xbf16>, vector<36x256xbf16>, vector<8x256xf32> -> vector<8x256xf32>
    %5 = vector.broadcast %3 : vector<1x256xf32> to vector<8x256xf32>
    %6 = arith.addf %4, %5 : vector<8x256xf32>
    %cst_5 = arith.constant 0.000000e+00 : f32
    %7 = vector.broadcast %cst_5 : f32 to vector<8x256xf32>
    %8 = arith.maximumf %6, %7 : vector<8x256xf32>
    %9 = arith.truncf %8 : vector<8x256xf32> to vector<8x256xbf16>
    %c48 = arith.constant 48 : index
    %c0_6 = arith.constant 0 : index
    %10 = vector.load %arg2[%c48, %c0_6] : memref<304x256xbf16, #tpu.memory_space<vmem>>, vector<256x128xbf16>
    %c1 = arith.constant 1 : index
    %c0_7 = arith.constant 0 : index
    %11 = vector.load %arg3[%c1, %c0_7] : memref<4x256xf32, #tpu.memory_space<vmem>>, vector<1x128xf32>
    %cst_8 = arith.constant dense<0.000000e+00> : vector<8x128xf32>
    %12 = tpu.matmul %9, %10, %cst_8 {dimension_numbers = #tpu.dot_dimension_numbers<[1], [0], [0], [1], [0, 0, 1, 1], [], []>} : vector<8x256xbf16>, vector<256x128xbf16>, vector<8x128xf32> -> vector<8x128xf32>
    %13 = vector.broadcast %11 : vector<1x128xf32> to vector<8x128xf32>
    %14 = arith.addf %12, %13 : vector<8x128xf32>
    %cst_9 = arith.constant 0.000000e+00 : f32
    %15 = vector.broadcast %cst_9 : f32 to vector<8x128xf32>
    %16 = arith.maximumf %14, %15 : vector<8x128xf32>
    %17 = arith.truncf %16 : vector<8x128xf32> to vector<8x128xbf16>
    %c48_10 = arith.constant 48 : index
    %c128 = arith.constant 128 : index
    %18 = vector.load %arg2[%c48_10, %c128] : memref<304x256xbf16, #tpu.memory_space<vmem>>, vector<128x128xbf16>
    %c2 = arith.constant 2 : index
    %c0_11 = arith.constant 0 : index
    %19 = vector.load %arg3[%c2, %c0_11] : memref<4x256xf32, #tpu.memory_space<vmem>>, vector<1x128xf32>
    %cst_12 = arith.constant dense<0.000000e+00> : vector<8x128xf32>
    %20 = tpu.matmul %17, %18, %cst_12 {dimension_numbers = #tpu.dot_dimension_numbers<[1], [0], [0], [1], [0, 0, 1, 1], [], []>} : vector<8x128xbf16>, vector<128x128xbf16>, vector<8x128xf32> -> vector<8x128xf32>
    %21 = vector.broadcast %19 : vector<1x128xf32> to vector<8x128xf32>
    %22 = arith.addf %20, %21 : vector<8x128xf32>
    %cst_13 = arith.constant 0.000000e+00 : f32
    %23 = vector.broadcast %cst_13 : f32 to vector<8x128xf32>
    %24 = arith.maximumf %22, %23 : vector<8x128xf32>
    %25 = arith.truncf %24 : vector<8x128xf32> to vector<8x128xbf16>
    %c176 = arith.constant 176 : index
    %c128_14 = arith.constant 128 : index
    %26 = vector.load %arg2[%c176, %c128_14] : memref<304x256xbf16, #tpu.memory_space<vmem>>, vector<128x128xbf16>
    %c3 = arith.constant 3 : index
    %c0_15 = arith.constant 0 : index
    %27 = vector.load %arg3[%c3, %c0_15] : memref<4x256xf32, #tpu.memory_space<vmem>>, vector<1x128xf32>
    %cst_16 = arith.constant dense<0.000000e+00> : vector<8x128xf32>
    %28 = tpu.matmul %25, %26, %cst_16 {dimension_numbers = #tpu.dot_dimension_numbers<[1], [0], [0], [1], [0, 0, 1, 1], [], []>} : vector<8x128xbf16>, vector<128x128xbf16>, vector<8x128xf32> -> vector<8x128xf32>
    %29 = vector.broadcast %27 : vector<1x128xf32> to vector<8x128xf32>
    %30 = arith.addf %28, %29 : vector<8x128xf32>
    %cst_17 = arith.constant dense<0xFF800000> : vector<8xf32>
    %31 = vector.multi_reduction <maximumf>, %30, %cst_17 [1] : vector<8x128xf32> to vector<8xf32>
    %32 = vector.shape_cast %31 : vector<8xf32> to vector<8x1xf32>
    %33 = vector.broadcast %32 : vector<8x1xf32> to vector<8x128xf32>
    %34 = arith.subf %30, %33 : vector<8x128xf32>
    %35 = math.exp %34 : vector<8x128xf32>
    %cst_18 = arith.constant dense<0.000000e+00> : vector<8xf32>
    %36 = vector.multi_reduction <add>, %35, %cst_18 [1] : vector<8x128xf32> to vector<8xf32>
    %37 = vector.shape_cast %36 : vector<8xf32> to vector<8x1xf32>
    %38 = tpu.reciprocal %37 : vector<8x1xf32> -> vector<8x1xf32>
    %39 = vector.broadcast %38 : vector<8x1xf32> to vector<8x128xf32>
    %40 = arith.mulf %35, %39 : vector<8x128xf32>
    %41 = vector.extract_strided_slice %40 {offsets = [0, 0], sizes = [8, 8], strides = [1, 1]} : vector<8x128xf32> to vector<8x8xf32>
    %c0_19 = arith.constant 0 : index
    %c0_20 = arith.constant 0 : index
    %42 = vector.load %arg4[%c0_19, %c0_20] : memref<8x8xf32, #tpu.memory_space<vmem>>, vector<8x8xf32>
    tpu.vector_store %arg4[%c0_19, %c0_20], %41 {strides = array<i32>} : memref<8x8xf32, #tpu.memory_space<vmem>>, vector<8x8xf32>,
    return
  }
  func.func @transform_0(%arg0: i32) -> (i32, i32) {
    %c0_i32 = arith.constant 0 : i32
    %c0_i32_0 = arith.constant 0 : i32
    return %arg0, %c0_i32 : i32, i32
  }
  func.func @transform_1(%arg0: i32) -> (i32, i32) {
    %c0_i32 = arith.constant 0 : i32
    %c0_i32_0 = arith.constant 0 : i32
    %c0_i32_1 = arith.constant 0 : i32
    return %c0_i32, %c0_i32_0 : i32, i32
  }
  func.func @transform_2(%arg0: i32) -> (i32, i32) {
    %c0_i32 = arith.constant 0 : i32
    %c0_i32_0 = arith.constant 0 : i32
    %c0_i32_1 = arith.constant 0 : i32
    return %c0_i32, %c0_i32_0 : i32, i32
  }
  func.func @transform_3(%arg0: i32) -> (i32, i32) {
    %c0_i32 = arith.constant 0 : i32
    %c0_i32_0 = arith.constant 0 : i32
    return %arg0, %c0_i32 : i32, i32
  }
}

</mosaic_0001>

<bundles_post_ra>
// kernel: tpu_custom_call.1
= control target key start
LH: loop header
LB: loop body
LE: loop exit
PB: predicated region body
PF: predicated region fallthrough
CT: control target
= control target key end

     0   :  { %8 = vsyncpa [#allocation3], 0  ;;  %s896_s0 = inlined_call_operand.hbm [shape: f32[8,36], index: 0, kind: input, shape index: {}]   ;;  %s897_s1 = inlined_call_operand.hbm [shape: bf16[304,256], index: 1, kind: input, shape index: {}]   ;;  %s898_s2 = inlined_call_operand.hbm [shape: f32[4,256], index: 2, kind: input, shape index: {}]   ;;  %s899_s3 = inlined_call_operand.hbm [shape: f32[8,8], index: 3, kind: output, shape index: {}]  }
   0x1   :  { %9 = vsyncpa [#allocation6], 0 }
   0x2   :  { %10 = vsyncpa [#allocation4], 0  ;;  %s837_s12 = smov [#allocation5]  }
   0x3   :  { %s26_s13 = sshll.u32 %s837_s12, 4  ;;  %s27_s13 = int_to_ptr.vmem [resolvable:$true] %s26_s13 }
   0x4   :  { %s759_s14 = scalar_lea.vmem %s27_s13, 4864  ;;  %p764_p1 = scmp.lt.s32.totalorder %s27_s13, %s27_s13 }
   0x5   :  { %p760_p0 = scmp.ne.s32.totalorder %s27_s13, %s759_s14  ;;  %p765_p2 = scmp.lt.s32.totalorder %s759_s14, %s759_s14 }
   0x7   :  { %p766_p3 = por %p765_p2, %p764_p1 }
   0x9   :  { %p767_p4 = pnand %p766_p3, %p760_p0 }
   0xb   :  { %770 = shalt.err (!%p767_p4)
}
   0xc   :  { %s838_s15 = smov 128   ;;  %s839_s16 = smov 8  }
   0xd   :  { %32 = dma.hbm_to_vmem [thread:$0]  %s897_s1, 4864, %s27_s13, [#allocation6], %s838_s15, %s838_s15, %s839_s16  }
   0xe   :  { %s840_s19 = smov [#allocation2]   ;;  %s841_s21 = smov [#allocation7]  }
   0xf   :  { %s17_s20 = sshll.u32 %s840_s19, 4  ;;  %s39_s22 = sshll.u32 %s841_s21, 4  ;;  %s18_s20 = int_to_ptr.vmem [resolvable:$true] %s17_s20  ;;  %s40_s22 = int_to_ptr.vmem [resolvable:$true] %s39_s22 }
  0x10   :  { %s779_s23 = scalar_lea.vmem %s18_s20, 128  ;;  %p784_p6 = scmp.lt.s32.totalorder %s18_s20, %s18_s20 }
  0x11   :  { %p780_p5 = scmp.ne.s32.totalorder %s18_s20, %s779_s23  ;;  %p785_p7 = scmp.lt.s32.totalorder %s779_s23, %s779_s23 }
  0x13   :  { %p786_p8 = por %p785_p7, %p784_p6 }
  0x15   :  { %p787_p9 = pnand %p786_p8, %p780_p5 }
  0x17   :  { %790 = shalt.err (!%p787_p9)
}
  0x18   :  { %20 = dma.hbm_to_vmem [thread:$0]  %s896_s0, 128, %s18_s20, [#allocation3]  }
  0x19   :  { %s799_s26 = scalar_lea.vmem %s40_s22, 128  ;;  %p804_p11 = scmp.lt.s32.totalorder %s40_s22, %s40_s22 }
  0x1a   :  { %p800_p10 = scmp.ne.s32.totalorder %s40_s22, %s799_s26  ;;  %p805_p12 = scmp.lt.s32.totalorder %s799_s26, %s799_s26 }
  0x1c   :  { %p806_p13 = por %p805_p12, %p804_p11 }
  0x1e   :  { %p807_p0 = pnand %p806_p13, %p800_p10 }
  0x20   :  { %810 = shalt.err (!%p807_p0)
}
  0x21   :  { %42 = dma.hbm_to_vmem [thread:$0]  %s898_s2, 128, %s40_s22, [#allocation6]  }
  0x22   :  { %831 = dma.done.wait [#allocation3], 128  }
  0x23   :  { %832 = vsyncadd [#allocation3], 4294967168 }
  0x24   :  { %833 = dma.done.wait [#allocation6], 4992  }
  0x25   :  { %834 = vsyncadd [#allocation6], 4294962304  ;;  %v842_v0 = vmov 0   ;;  %v59_v1 = vld [vmem:[#allocation5 + $0x20] sm:$0x33]  ;;  %vm101_vm0 = vcmask 1041408   ;;  %v62_v33 = vlaneseq }
  0x26   :  { %140 = vmatprep.mubr.bf16.mxu0 %v842_v0  ;;  %v580_v2 = vcombine.high %v59_v1, %v59_v1  ;;  %v579_v3 = vcombine.low %v59_v1, %v59_v1  ;;  %v709_v4 = vld [vmem:[#allocation5 + $0x14] ss:$8 sps:$4 sm:$0xff]   ;;  %v711_v5 = vld [vmem:[#allocation5 + $0x10] ss:$8 sps:$4 sm:$0xff]   ;;  %v712_v7 = vld [vmem:[#allocation5 + $0x4] ss:$8 sps:$4 sm:$0xff]  }
  0x27   :  { %v715_v8 = vld [vmem:[#allocation5 + $0x120] ss:$8 sps:$4 sm:$0xff]   ;;  %v53_v11 = vld [vmem:[#allocation2] sm:$0xff]  ;;  %vm97_vm1 = vcmask 293888   ;;  %v731_v27 = vld [vmem:[#allocation5 + $0xa4] ss:$8 sps:$4 sm:$0xff]  }
  0x28   :  { %581 = vmatprep.subr.msk.bf16.mxu0 %vm101_vm0, %v580_v2  ;;  %v103_v6 = vsel %vm101_vm0, %v579_v3, 0  ;;  %v716_v9 = vld [vmem:[#allocation5 + $0xa0] ss:$8 sps:$4 sm:$0xff]   ;;  %618 = vmatprep.subr.bf16.mxu1 %v715_v8  ;;  %v717_v12 = vld [vmem:[#allocation5 + $0x110] ss:$8 sps:$4 sm:$0xff]   ;;  %v54_v15 = vpack.c.bf16 %v53_v11, %v53_v11  ;;  %v843_v28 = vmov 0.0  }
  0x29   :  { %119 = vmatpush1.bf16.msra.mxu0 %v103_v6  ;;  %v714_v10 = vld [vmem:[#allocation5] ss:$8 sps:$4 sm:$0xff]   ;;  %619 = vmatpush3.bf16.msra.mxu1 %v716_v9  ;;  %v718_v13 = vld [vmem:[#allocation5 + $0x90] ss:$8 sps:$4 sm:$0xff]   ;;  %v732_v29 = vld [vmem:[#allocation5 + $0x94] ss:$8 sps:$4 sm:$0xff]  }
  0x2a   :  { %120 = vmatprep.subr.bf16.mxu0 %v709_v4  ;;  %620 = vmatprep.subr.bf16.mxu1 %v717_v12  ;;  %v719_v14 = vld [vmem:[#allocation5 + $0x100] ss:$8 sps:$4 sm:$0xff]   ;;  %v721_v17 = vld [vmem:[#allocation5 + $0xf0] ss:$8 sps:$4 sm:$0xff]   ;;  %v733_v30 = vld [vmem:[#allocation5 + $0x84] ss:$8 sps:$4 sm:$0xff]  }
  0x2b   :  { %v720_v16 = vld [vmem:[#allocation5 + $0x80] ss:$8 sps:$4 sm:$0xff]   ;;  %v722_v18 = vld [vmem:[#allocation5 + $0x70] ss:$8 sps:$4 sm:$0xff]   ;;  %v734_v31 = vld [vmem:[#allocation5 + $0x74] ss:$8 sps:$4 sm:$0xff]  }
  0x2c   :  { %v723_v19 = vld [vmem:[#allocation5 + $0xe0] ss:$8 sps:$4 sm:$0xff]   ;;  %v725_v21 = vld [vmem:[#allocation5 + $0xd0] ss:$8 sps:$4 sm:$0xff]   ;;  %v735_v32 = vld [vmem:[#allocation5 + $0x64] ss:$8 sps:$4 sm:$0xff]  }
  0x2d   :  { %121 = vmatpush1.bf16.msra.mxu0 %v711_v5  ;;  %621 = vmatpush3.bf16.msra.mxu1 %v718_v13  ;;  %v724_v20 = vld [vmem:[#allocation5 + $0x60] ss:$8 sps:$4 sm:$0xff]   ;;  %v726_v22 = vld [vmem:[#allocation5 + $0x50] ss:$8 sps:$4 sm:$0xff]   ;;  %v63_v34 = vshrl.u32 %v62_v33, 7  ;;  %vm844_vm2 = vmmov 0  }
  0x2e   :  { %122 = vmatprep.subr.bf16.mxu0 %v712_v7  ;;  %622 = vmatprep.subr.bf16.mxu1 %v719_v14  ;;  %v727_v23 = vld [vmem:[#allocation5 + $0xc0] ss:$8 sps:$4 sm:$0xff]   ;;  %v729_v25 = vld [vmem:[#allocation5 + $0xb0] ss:$8 sps:$4 sm:$0xff]   ;;  %v736_v50 = vld [vmem:[#allocation5 + $0x54] ss:$8 sps:$4 sm:$0xff]  }
  0x2f   :  { %v728_v24 = vld [vmem:[#allocation5 + $0x40] ss:$8 sps:$4 sm:$0xff]   ;;  %v730_v26 = vld [vmem:[#allocation5 + $0x30] ss:$8 sps:$4 sm:$0xff]   ;;  %v64_v35 = vsub.s32 0, %v63_v34  ;;  %v68_v37 = vsub.s32 1, %v63_v34 }
  0x30   :  { %v60_v36 = vld [vmem:[#allocation7] ss:$4 sm:$0x3]  ;;  %v737_v51 = vld [vmem:[#allocation5 + $0x44] ss:$8 sps:$4 sm:$0xff]   ;;  %s845_s0 = smov [#allocation8]  }
  0x31   :  { %123 = vmatpush1.bf16.msra.mxu0 %v714_v10  ;;  %623 = vmatpush3.bf16.msra.mxu1 %v720_v16  ;;  %v65_v38 = vrot.slane %v60_v36, %v64_v35  ;;  %v69_v39 = vrot.slane %v60_v36, %v68_v37  ;;  %v738_v52 = vld [vmem:[#allocation5 + $0x34] ss:$8 sps:$4 sm:$0xff]   ;;  %v739_v53 = vld [vmem:[#allocation5 + $0x124] ss:$8 sps:$4 sm:$0xff]   ;;  %v583_v60 = vld [vmem:[#allocation7 + $0x1] ss:$0 sm:$0xff] }
  0x32   :  { %624 = vmatprep.subr.bf16.mxu1 %v721_v17  ;;  %658 = vmatprep.subr.bf16.mxu0 %v843_v28  ;;  %v740_v54 = vld [vmem:[#allocation5 + $0x114] ss:$8 sps:$4 sm:$0xff]   ;;  %v741_v55 = vld [vmem:[#allocation5 + $0x104] ss:$8 sps:$4 sm:$0xff]   ;;  %v600_v6 = vld [vmem:[#allocation7 + $0x2] ss:$0 sm:$0xff] }
  0x33   :  { %v742_v56 = vld [vmem:[#allocation5 + $0xf4] ss:$8 sps:$4 sm:$0xff]   ;;  %v743_v57 = vld [vmem:[#allocation5 + $0xe4] ss:$8 sps:$4 sm:$0xff]   ;;  %v609_v14 = vld [vmem:[#allocation7 + $0x3] ss:$0 sm:$0xff] }
  0x34   :  { %582 = vmatmul.mubr.msk.bf16.vlgmr.msra.gmra.mxu0 %vm97_vm1, %v54_v15  ;;  %v744_v58 = vld [vmem:[#allocation5 + $0xd4] ss:$8 sps:$4 sm:$0xff]   ;;  %v745_v4 = vld [vmem:[#allocation5 + $0xc4] ss:$8 sps:$4 sm:$0xff]   ;;  %s565_s2 = sshll.u32 %s845_s0, 4  ;;  %vm557_vm3 = vcmask 64512   ;;  %s566_s2 = int_to_ptr.vmem [resolvable:$true] %s565_s2 }
  0x35   :  { %625 = vmatpush3.bf16.msra.mxu1 %v722_v18  ;;  %659 = vmatpush3.bf16.msra.mxu0 %v731_v27  ;;  %v746_v5 = vld [vmem:[#allocation5 + $0xb4] ss:$8 sps:$4 sm:$0xff]   ;;  %s811_s28 = scalar_lea.vmem %s566_s2, 128  ;;  %p816_p2 = scmp.lt.s32.totalorder %s566_s2, %s566_s2 }
  0x36   :  { %626 = vmatprep.subr.bf16.mxu1 %v723_v19  ;;  %660 = vmatprep.subr.bf16.mxu0 %v843_v28  ;;  %p812_p1 = scmp.ne.s32.totalorder %s566_s2, %s811_s28  ;;  %p817_p3 = scmp.lt.s32.totalorder %s811_s28, %s811_s28 }
  0x37   :  { %674 = vmatprep.mubr.msk.bf16.mxu0 %vm844_vm2, %v843_v28 }
  0x38   :  { %p818_p4 = por %p817_p3, %p816_p2 }
  0x39   :  { %627 = vmatpush3.bf16.msra.mxu1 %v724_v20  ;;  %661 = vmatpush3.bf16.msra.mxu0 %v732_v29 }
  0x3a   :  { %628 = vmatprep.subr.bf16.mxu1 %v725_v21  ;;  %662 = vmatprep.subr.bf16.mxu0 %v843_v28  ;;  %p819_p5 = pnand %p818_p4, %p812_p1 }
  0x3d   :  { %629 = vmatpush3.bf16.msra.mxu1 %v726_v22  ;;  %663 = vmatpush3.bf16.msra.mxu0 %v733_v30 }
  0x3e   :  { %630 = vmatprep.subr.bf16.mxu1 %v727_v23  ;;  %664 = vmatprep.subr.bf16.mxu0 %v843_v28 }
  0x41   :  { %631 = vmatpush3.bf16.msra.mxu1 %v728_v24  ;;  %665 = vmatpush3.bf16.msra.mxu0 %v734_v31 }
  0x42   :  { %632 = vmatprep.subr.bf16.mxu1 %v729_v25  ;;  %666 = vmatprep.subr.bf16.mxu0 %v843_v28 }
  0x45   :  { %633 = vmatpush3.bf16.msra.mxu1 %v730_v26  ;;  %667 = vmatpush3.bf16.msra.mxu0 %v735_v32 }
  0x46   :  { %678 = vmatprep.subr.bf16.mxu1 %v843_v28  ;;  %668 = vmatprep.subr.bf16.mxu0 %v843_v28 }
  0x49   :  { %669 = vmatpush3.bf16.msra.mxu0 %v736_v50 }
  0x4a   :  { %670 = vmatprep.subr.bf16.mxu0 %v843_v28 }
  0x4d   :  { %671 = vmatpush3.bf16.msra.mxu0 %v737_v51 }
  0x4e   :  { %672 = vmatprep.subr.bf16.mxu0 %v843_v28 }
  0x51   :  { %673 = vmatpush3.bf16.msra.mxu0 %v738_v52 }
  0xf4   :  { %v142_v40 = vpop.f32.mrf.mxu0 }
  0xf5   :  { %v143_v41 = vadd.f32 %v142_v40, %v65_v38 }
  0xf6   :  { %v144_v42 = vpop.f32.mrf.mxu0 }
  0xf7   :  { %v145_v43 = vadd.f32 %v144_v42, %v69_v39  ;;  %v149_v44 = vmax.f32 %v143_v41, 0.0 }
  0xf8   :  { %v146_v45 = vpop.f32.mrf.mxu0 }
  0xf9   :  { %v150_v46 = vmax.f32 %v145_v43, 0.0  ;;  %v151_v49 = vpack.c.bf16 %v149_v44, %v149_v44 }
  0xfa   :  { %v147_v47 = vpop.f32.mrf.mxu0 }
  0xfb   :  { %v152_v48 = vpack.c.bf16 %v150_v46, %v150_v46 }
  0xfd   :  { %318 = vmatprep.mubr.bf16.mxu1 %v152_v48 }
  0xfe   :  { %319 = vmatmul.mubr.bf16.vlgmr.msra.gmra.mxu1 %v151_v49 }
  0xff   :  { %694 = vmatprep.mubr.msk.bf16.mxu1 %vm844_vm2, %v843_v28  ;;  %679 = vmatpush3.bf16.msra.mxu1 %v739_v53 }
 0x100   :  { %680 = vmatprep.subr.bf16.mxu1 %v843_v28 }
 0x103   :  { %681 = vmatpush3.bf16.msra.mxu1 %v740_v54 }
 0x104   :  { %682 = vmatprep.subr.bf16.mxu1 %v843_v28 }
 0x107   :  { %683 = vmatpush3.bf16.msra.mxu1 %v741_v55 }
 0x108   :  { %684 = vmatprep.subr.bf16.mxu1 %v843_v28 }
 0x10b   :  { %685 = vmatpush3.bf16.msra.mxu1 %v742_v56 }
 0x10c   :  { %686 = vmatprep.subr.bf16.mxu1 %v843_v28 }
 0x10f   :  { %687 = vmatpush3.bf16.msra.mxu1 %v743_v57 }
 0x110   :  { %688 = vmatprep.subr.bf16.mxu1 %v843_v28 }
 0x113   :  { %689 = vmatpush3.bf16.msra.mxu1 %v744_v58 }
 0x114   :  { %690 = vmatprep.subr.bf16.mxu1 %v843_v28 }
 0x117   :  { %691 = vmatpush3.bf16.msra.mxu1 %v745_v4 }
 0x118   :  { %692 = vmatprep.subr.bf16.mxu1 %v843_v28 }
 0x11b   :  { %693 = vmatpush3.bf16.msra.mxu1 %v746_v5 }
 0x1be   :  { %v634_v59 = vpop.f32.mrf.mxu1 }
 0x1c0   :  { %v635_v61 = vpop.f32.mrf.mxu1 }
 0x1c1   :  { %v636_v62 = vadd.f32 %v635_v61, %v634_v59 }
 0x1c2   :  { %v637_v63 = vpop.f32.mrf.mxu1 }
 0x1c3   :  { %v321_v0 = vadd.f32 %v636_v62, %v583_v60 }
 0x1c4   :  { %v638_v1 = vpop.f32.mrf.mxu1 }
 0x1c5   :  { %v326_v2 = vmax.f32 %v321_v0, 0.0 }
 0x1c7   :  { %v327_v3 = vpack.c.bf16 %v326_v2, %v326_v2 }
 0x1c9   :  { %675 = vmatmul.mubr.bf16.vlgmr.msra.gmra.mxu0 %v327_v3 }
 0x289   :  { %v431_v7 = vpop.f32.mrf.mxu0 }
 0x28a   :  { %v432_v8 = vadd.f32 %v600_v6, %v431_v7 }
 0x28b   :  { %v676_v9 = vpop.f32.mrf.mxu0 }
 0x28c   :  { %v437_v10 = vmax.f32 %v432_v8, 0.0 }
 0x28d   :  { %v434_v11 = vpop.f32.mrf.mxu0 }
 0x28e   :  { %v438_v12 = vpack.c.bf16 %v437_v10, %v437_v10 }
 0x28f   :  { %v677_v13 = vpop.f32.mrf.mxu0 }
 0x290   :  { %695 = vmatmul.mubr.bf16.vlgmr.msra.gmra.mxu1 %v438_v12 }
 0x350   :  { %v542_v15 = vpop.f32.mrf.mxu1 }
 0x351   :  { %v543_v16 = vadd.f32 %v609_v14, %v542_v15 }
 0x352   :  { %v696_v17 = vpop.f32.mrf.mxu1 }
 0x353   :  { %548 = vmax.xlane.f32.xlu0 %v543_v16 }
 0x354   :  { %v545_v18 = vpop.f32.mrf.mxu1 }
 0x356   :  { %v697_v19 = vpop.f32.mrf.mxu1 }
 0x3dc   :  { %v549_v20 = vpop.xlane.xlu0 %548 }
 0x3dd   :  { %v550_v21 = vsub.f32 %v543_v16, %v549_v20 }
 0x3df   :  { %v551_v22 = vmul.f32 1.442695, %v550_v21 }
 0x3e1   :  { %747 = vpow2.f32 %v551_v22 }
 0x3ee   :  { %v748_v23 = vpop.eup %747 }
 0x3ef   :  { %553 = vadd.xlane.f32.xlu0 %v748_v23 }
 0x478   :  { %v554_v24 = vpop.xlane.xlu0 %553 }
 0x479   :  { %749 = vrcp.f32 %v554_v24 }
 0x486   :  { %v750_v25 = vpop.eup %749 }
 0x487   :  { %v556_v26 = vmul.f32 %v750_v25, %v748_v23 }
 0x489   :  { %558 = vst.msk [vmem:[#allocation8] sm:$0xff] %vm557_vm3, %v556_v26 }
 0x48a   :  { %822 = shalt.err (!%p819_p5)
}
 0x48b   :  { %568 = dma.vmem_to_hbm [thread:$0]  %s566_s2, 128, %s899_s3, [#allocation4]  }
 0x48c   :  { %835 = dma.done.wait [#allocation4], 128  }
 0x48d   :  { %836 = vsyncadd [#allocation4], 4294967168 }
 0x48e   :  { %572 = vsyncpa [#allocation3], 1 }
 0x48f   :  { %573 = vsyncpa [#allocation6], 1 }
 0x490   :  { %574 = vsyncpa [#allocation4], 1 }

</bundles_post_ra>
